<compile_context>
chip_gen: v5e
topology: v5e:2x2
jax: 0.10.0
libtpu: 0.0.40
codegen_flags: <defaults>
</compile_context>

<pallas_src>
import functools

import jax
import jax.numpy as jnp
from jax.experimental import pallas as pl
from jax.experimental.pallas import tpu as pltpu

_LANE = 128      # lane width: last dim 128-dense -> unmasked vst / full MXU tiles
_SUBLANE = 8     # f32 sublane count


def _round_up(x, m):
    return (x + m - 1) // m * m


def _fused_mlp_kernel(*refs, n_layers):
    """refs = (x_ref, w0_ref, b0_ref, w1_ref, b1_ref, ..., out_ref).

    Statically unrolled over layers; intermediates never touch HBM.
    x_ref: (tm, D0p)   wi_ref: (Dip, D(i+1)p)   bi_ref: (1, D(i+1)p)   out: (tm, DLp)
    """
    x_ref = refs[0]
    out_ref = refs[-1]
    h = x_ref[...]
    for i in range(n_layers):
        w_ref = refs[1 + 2 * i]
        b_ref = refs[2 + 2 * i]
        # Cast LHS to the weight dtype (f32 or bf16); always accumulate in f32 on the MXU.
        y = jnp.dot(h.astype(w_ref.dtype), w_ref[...],
                    preferred_element_type=jnp.float32)
        y = y + b_ref[...].astype(jnp.float32)   # bias broadcast over rows
        if i != n_layers - 1:
            y = jnp.maximum(y, 0.0)               # ReLU on hidden layers only
        h = y
    out_ref[...] = h.astype(out_ref.dtype)


def prepare_mlp_params(params, param_dtype=jnp.float32):
    """Pad params ONCE to 128-lane boundaries (hoisted out of the per-call path).

    params: list of (w, b) with w shaped (d_in, d_out) (= torch weight.T), b (d_out,)
    Zero padding is mathematically exact through matmul + bias + ReLU.
    """
    dims = [params[0][0].shape[0]] + [w.shape[1] for w, _ in params]
    dims_p = [_round_up(d, _LANE) for d in dims]
    padded = []
    for li, (w, b) in enumerate(params):
        di, do = dims[li], dims[li + 1]
        dip, dop = dims_p[li], dims_p[li + 1]
        w_p = jnp.zeros((dip, dop), param_dtype).at[:di, :do].set(w.astype(param_dtype))
        b_p = jnp.zeros((1, dop), param_dtype).at[0, :do].set(b.astype(param_dtype))
        padded.append((w_p, b_p))
    return {"padded": padded, "dims": dims, "dims_p": dims_p}


def _default_tile_m_max():
    # v5e MXU M-dim is 128 (and only 1 vst slot) -> tm=128; v6e/v7x -> 256.
    try:
        kind = jax.devices()[0].device_kind.lower()
    except Exception:
        kind = ""
    return 128 if "v5" in kind else 256


def mlp_forward(prepared, x, *, tile_m_max=None, min_grid_blocks=2):
    """Fused MLP forward: one pallas_call for the entire network.

    prepared: output of prepare_mlp_params (padded weights are reused across calls).
    x:        (batch, d_in)
    """
    dims, dims_p, padded = prepared["dims"], prepared["dims_p"], prepared["padded"]
    n_layers = len(padded)
    batch, d_in = x.shape
    assert d_in == dims[0], f"expected d_in={dims[0]}, got {d_in}"

    if tile_m_max is None:
        tile_m_max = _default_tile_m_max()

    # --- tile-M selection: keep >= min_grid_blocks grid steps when batch allows,
    #     so pipelining / megacore sharding (v7x 2 TCs) is not disabled at small batch.
    batch_s = _round_up(batch, _SUBLANE)
    if batch_s >= min_grid_blocks * _SUBLANE:
        tm = min(tile_m_max, _round_up(pl.cdiv(batch_s, min_grid_blocks), _SUBLANE))
    else:
        tm = batch_s
    batch_p = _round_up(batch, tm)
    grid = (batch_p // tm,)

    d_in_p, d_out, d_out_p = dims_p[0], dims[-1], dims_p[-1]

    # Skip the extra HBM copy when x is already aligned.
    if batch_p == batch and d_in_p == d_in:
        x_p = x
    else:
        x_p = jnp.zeros((batch_p, d_in_p), x.dtype).at[:batch, :d_in].set(x)

    resident = pl.Buffered(1)  # grid-invariant operands: DMA once, single-buffered
    operands = [x_p]
    in_specs = [pl.BlockSpec((tm, d_in_p), lambda i: (i, 0))]
    for (w_p, b_p) in padded:
        dip, dop = w_p.shape
        operands += [w_p, b_p]
        in_specs += [
            pl.BlockSpec((dip, dop), lambda i: (0, 0), pipeline_mode=resident),
            pl.BlockSpec((1, dop), lambda i: (0, 0), pipeline_mode=resident),
        ]
    out_spec = pl.BlockSpec((tm, d_out_p), lambda i: (i, 0))

    # --- explicit VMEM budget: resident params (single-buffered) + 2x I/O blocks
    #     + live f32 intermediates, with headroom; capped at 64 MiB (valid on v7x).
    weight_bytes = sum(int(w.size) * w.dtype.itemsize + int(b.size) * b.dtype.itemsize
                       for w, b in padded)
    io_bytes = 2 * tm * (d_in_p + d_out_p) * x.dtype.itemsize
    act_bytes = 2 * tm * max(dims_p) * 4
    vmem_limit = int(1.5 * (weight_bytes + io_bytes + act_bytes)) + (4 << 20)
    vmem_limit = min(64 << 20, max(vmem_limit, 16 << 20))

    flops = 2 * batch_p * sum(dims_p[i] * dims_p[i + 1] for i in range(n_layers))
    bytes_accessed = (int(x_p.size) * x_p.dtype.itemsize
                      + weight_bytes
                      + batch_p * d_out_p * x.dtype.itemsize)
    cost = pl.CostEstimate(flops=flops, transcendentals=0,
                           bytes_accessed=bytes_accessed)

    out_p = pl.pallas_call(
        functools.partial(_fused_mlp_kernel, n_layers=n_layers),
        out_shape=jax.ShapeDtypeStruct((batch_p, d_out_p), x.dtype),
        grid=grid,
        in_specs=in_specs,
        out_specs=out_spec,
        compiler_params=pltpu.CompilerParams(
            dimension_semantics=("parallel",),
            vmem_limit_bytes=vmem_limit,
        ),
        cost_estimate=cost,
    )(*operands)

    if batch_p == batch and d_out_p == d_out:
        return out_p
    return out_p[:batch, :d_out]


def init_mlp_params(key, dims):
    """Deterministic init mirroring nn.Linear default (uniform +/- 1/sqrt(fan_in)).

    Weights are stored as (in_features, out_features) == PyTorch weight.T.
    """
    params = []
    for i in range(len(dims) - 1):
        d_in, d_out = dims[i], dims[i + 1]
        key, kw, kb = jax.random.split(key, 3)
        bound = 1.0 / jnp.sqrt(jnp.float32(d_in))
        w = jax.random.uniform(kw, (d_in, d_out), jnp.float32, -bound, bound)
        b = jax.random.uniform(kb, (d_out,), jnp.float32, -bound, bound)
        params.append((w, b))
    return params


if __name__ == "__main__":
    # Small shapes consistent with the generic MLP: dims = [16, 32, 32, 8], batch = 64.
    # tm=32 -> grid=(2,): exercises the multi-block pipelined path.
    dims = [16, 32, 32, 8]
    batch = 64

    key = jax.random.PRNGKey(0)
    key, kx = jax.random.split(key)
    x = jax.random.normal(kx, (batch, dims[0]), dtype=jnp.float32)
    params = init_mlp_params(key, dims)

    prepared = prepare_mlp_params(params)          # padding hoisted: done once
    out = jax.block_until_ready(mlp_forward(prepared, x))

    # Correctness check against plain-JAX reference.
    ref = x
    for i, (w, b) in enumerate(params):
        ref = ref @ w + b
        if i != len(params) - 1:
            ref = jnp.maximum(ref, 0.0)
    assert out.shape == (batch, dims[-1])
    assert jnp.allclose(out, ref, atol=1e-5, rtol=1e-5)

    # TODO(synk): optional nn.Dropout / output_activation_fn / Flatten(squeeze_output)
    # branches of the PyTorch MLP are disabled by default and not implemented here.
    print("KERNEL_OK")
</pallas_src>

<mosaic_0001>
module attributes {stable_mosaic.version = 11 : i64} {
  func.func @_fused_mlp_kernel(%arg0: i32, %arg1: memref<32x128xf32, #tpu.memory_space<vmem>>, %arg2: memref<128x128xf32, #tpu.memory_space<vmem>>, %arg3: memref<1x128xf32, #tpu.memory_space<vmem>>, %arg4: memref<128x128xf32, #tpu.memory_space<vmem>>, %arg5: memref<1x128xf32, #tpu.memory_space<vmem>>, %arg6: memref<128x128xf32, #tpu.memory_space<vmem>>, %arg7: memref<1x128xf32, #tpu.memory_space<vmem>>, %arg8: memref<32x128xf32, #tpu.memory_space<vmem>>) attributes {dimension_semantics = [#tpu.dimension_semantics<parallel>], iteration_bounds = array<i64: 2>, scalar_prefetch = 0 : i64, scratch_operands = 0 : i64, tpu.core_type = #tpu.core_type<tc>, window_params = [{transform_indices = @transform_0, window_bounds = array<i64: 32, 128>}, {pipeline_mode = #tpu.pipeline_mode<synchronous>, transform_indices = @transform_1, window_bounds = array<i64: 128, 128>}, {pipeline_mode = #tpu.pipeline_mode<synchronous>, transform_indices = @transform_2, window_bounds = array<i64: 1, 128>}, {pipeline_mode = #tpu.pipeline_mode<synchronous>, transform_indices = @transform_3, window_bounds = array<i64: 128, 128>}, {pipeline_mode = #tpu.pipeline_mode<synchronous>, transform_indices = @transform_4, window_bounds = array<i64: 1, 128>}, {pipeline_mode = #tpu.pipeline_mode<synchronous>, transform_indices = @transform_5, window_bounds = array<i64: 128, 128>}, {pipeline_mode = #tpu.pipeline_mode<synchronous>, transform_indices = @transform_6, window_bounds = array<i64: 1, 128>}, {transform_indices = @transform_7, window_bounds = array<i64: 32, 128>}]} {
    %c0 = arith.constant 0 : index
    %c0_0 = arith.constant 0 : index
    %0 = vector.load %arg1[%c0, %c0_0] : memref<32x128xf32, #tpu.memory_space<vmem>>, vector<32x128xf32>
    %c0_1 = arith.constant 0 : index
    %c0_2 = arith.constant 0 : index
    %1 = vector.load %arg2[%c0_1, %c0_2] : memref<128x128xf32, #tpu.memory_space<vmem>>, vector<128x128xf32>
    %cst = arith.constant dense<0.000000e+00> : vector<32x128xf32>
    %2 = tpu.matmul %0, %1, %cst {dimension_numbers = #tpu.dot_dimension_numbers<[1], [0], [0], [1], [0, 0, 1, 1], [], []>} : vector<32x128xf32>, vector<128x128xf32>, vector<32x128xf32> -> vector<32x128xf32>
    %c0_3 = arith.constant 0 : index
    %c0_4 = arith.constant 0 : index
    %3 = vector.load %arg3[%c0_3, %c0_4] : memref<1x128xf32, #tpu.memory_space<vmem>>, vector<1x128xf32>
    %4 = vector.broadcast %3 : vector<1x128xf32> to vector<32x128xf32>
    %5 = arith.addf %2, %4 : vector<32x128xf32>
    %cst_5 = arith.constant 0.000000e+00 : f32
    %6 = vector.broadcast %cst_5 : f32 to vector<32x128xf32>
    %7 = arith.maximumf %5, %6 : vector<32x128xf32>
    %c0_6 = arith.constant 0 : index
    %c0_7 = arith.constant 0 : index
    %8 = vector.load %arg4[%c0_6, %c0_7] : memref<128x128xf32, #tpu.memory_space<vmem>>, vector<128x128xf32>
    %cst_8 = arith.constant dense<0.000000e+00> : vector<32x128xf32>
    %9 = tpu.matmul %7, %8, %cst_8 {dimension_numbers = #tpu.dot_dimension_numbers<[1], [0], [0], [1], [0, 0, 1, 1], [], []>} : vector<32x128xf32>, vector<128x128xf32>, vector<32x128xf32> -> vector<32x128xf32>
    %c0_9 = arith.constant 0 : index
    %c0_10 = arith.constant 0 : index
    %10 = vector.load %arg5[%c0_9, %c0_10] : memref<1x128xf32, #tpu.memory_space<vmem>>, vector<1x128xf32>
    %11 = vector.broadcast %10 : vector<1x128xf32> to vector<32x128xf32>
    %12 = arith.addf %9, %11 : vector<32x128xf32>
    %cst_11 = arith.constant 0.000000e+00 : f32
    %13 = vector.broadcast %cst_11 : f32 to vector<32x128xf32>
    %14 = arith.maximumf %12, %13 : vector<32x128xf32>
    %c0_12 = arith.constant 0 : index
    %c0_13 = arith.constant 0 : index
    %15 = vector.load %arg6[%c0_12, %c0_13] : memref<128x128xf32, #tpu.memory_space<vmem>>, vector<128x128xf32>
    %cst_14 = arith.constant dense<0.000000e+00> : vector<32x128xf32>
    %16 = tpu.matmul %14, %15, %cst_14 {dimension_numbers = #tpu.dot_dimension_numbers<[1], [0], [0], [1], [0, 0, 1, 1], [], []>} : vector<32x128xf32>, vector<128x128xf32>, vector<32x128xf32> -> vector<32x128xf32>
    %c0_15 = arith.constant 0 : index
    %c0_16 = arith.constant 0 : index
    %17 = vector.load %arg7[%c0_15, %c0_16] : memref<1x128xf32, #tpu.memory_space<vmem>>, vector<1x128xf32>
    %18 = vector.broadcast %17 : vector<1x128xf32> to vector<32x128xf32>
    %19 = arith.addf %16, %18 : vector<32x128xf32>
    %c0_17 = arith.constant 0 : index
    %c0_18 = arith.constant 0 : index
    %20 = vector.load %arg8[%c0_17, %c0_18] : memref<32x128xf32, #tpu.memory_space<vmem>>, vector<32x128xf32>
    tpu.vector_store %arg8[%c0_17, %c0_18], %19 {strides = array<i32>} : memref<32x128xf32, #tpu.memory_space<vmem>>, vector<32x128xf32>,
    return
  }
  func.func @transform_0(%arg0: i32) -> (i32, i32) {
    %c0_i32 = arith.constant 0 : i32
    %c0_i32_0 = arith.constant 0 : i32
    return %arg0, %c0_i32 : i32, i32
  }
  func.func @transform_1(%arg0: i32) -> (i32, i32) {
    %c0_i32 = arith.constant 0 : i32
    %c0_i32_0 = arith.constant 0 : i32
    %c0_i32_1 = arith.constant 0 : i32
    return %c0_i32, %c0_i32_0 : i32, i32
  }
  func.func @transform_2(%arg0: i32) -> (i32, i32) {
    %c0_i32 = arith.constant 0 : i32
    %c0_i32_0 = arith.constant 0 : i32
    %c0_i32_1 = arith.constant 0 : i32
    return %c0_i32, %c0_i32_0 : i32, i32
  }
  func.func @transform_3(%arg0: i32) -> (i32, i32) {
    %c0_i32 = arith.constant 0 : i32
    %c0_i32_0 = arith.constant 0 : i32
    %c0_i32_1 = arith.constant 0 : i32
    return %c0_i32, %c0_i32_0 : i32, i32
  }
  func.func @transform_4(%arg0: i32) -> (i32, i32) {
    %c0_i32 = arith.constant 0 : i32
    %c0_i32_0 = arith.constant 0 : i32
    %c0_i32_1 = arith.constant 0 : i32
    return %c0_i32, %c0_i32_0 : i32, i32
  }
  func.func @transform_5(%arg0: i32) -> (i32, i32) {
    %c0_i32 = arith.constant 0 : i32
    %c0_i32_0 = arith.constant 0 : i32
    %c0_i32_1 = arith.constant 0 : i32
    return %c0_i32, %c0_i32_0 : i32, i32
  }
  func.func @transform_6(%arg0: i32) -> (i32, i32) {
    %c0_i32 = arith.constant 0 : i32
    %c0_i32_0 = arith.constant 0 : i32
    %c0_i32_1 = arith.constant 0 : i32
    return %c0_i32, %c0_i32_0 : i32, i32
  }
  func.func @transform_7(%arg0: i32) -> (i32, i32) {
    %c0_i32 = arith.constant 0 : i32
    %c0_i32_0 = arith.constant 0 : i32
    return %arg0, %c0_i32 : i32, i32
  }
}

</mosaic_0001>

<bundles_post_ra>
// kernel: tpu_custom_call.1
= control target key start
LH: loop header
LB: loop body
LE: loop exit
PB: predicated region body
PF: predicated region fallthrough
CT: control target
= control target key end

     0   :  { %s1186_s0 = inlined_call_operand.hbm [shape: f32[64,128], index: 0, kind: input, shape index: {}]   ;;  %s1187_s1 = inlined_call_operand.hbm [shape: f32[128,128], index: 1, kind: input, shape index: {}]   ;;  %s1188_s2 = inlined_call_operand.vmem [shape: f32[1,128], index: 2, kind: input, shape index: {}]   ;;  %s1189_s3 = inlined_call_operand.hbm [shape: f32[128,128], index: 3, kind: input, shape index: {}]   ;;  %s1190_s4 = inlined_call_operand.vmem [shape: f32[1,128], index: 4, kind: input, shape index: {}]   ;;  %s1191_s5 = inlined_call_operand.hbm [shape: f32[128,128], index: 5, kind: input, shape index: {}]   ;;  %s1192_s6 = inlined_call_operand.vmem [shape: f32[1,128], index: 6, kind: input, shape index: {}]   ;;  %s1193_s7 = inlined_call_operand.hbm [shape: f32[64,128], index: 7, kind: output, shape index: {}]  }
   0x1   :  { %1196 = sst [smem:[#allocation15_spill]] %s1187_s1 }
   0x2   :  { %12 = vsyncpa [#allocation3], 0 }
   0x3   :  { %14 = vsyncpa [#allocation3 + $0x1], 0 }
   0x4   :  { %15 = vsyncpa [#allocation6], 0 }
   0x5   :  { %16 = vsyncpa [#allocation9], 0 }
   0x6   :  { %17 = vsyncpa [#allocation4], 0 }
   0x7   :  { %19 = vsyncpa [#allocation4 + $0x1], 0  ;;  %s997_s24 = smov 0   ;;  %s999_s25 = smov 0  }
   0x8   :  { %s1001_s26 = smov 0   ;;  %s1003_s27 = smov 0  }
   0x9 LB: > { %s1018_s28 = sadd.s32 4294967295, %s948_s27   ;;  %s632_s29 = sadd.s32 4294967294, %s948_s27   ;;  %s948_s27 = sphi %s1003_s27, %s1210_s27   ;;  %s944_s26 = sphi %s1001_s26, %s1209_s26   ;;  %s940_s25 = sphi %s999_s25, %s1208_s25   ;;  %s936_s24 = sphi %s997_s24, %s1207_s24  }
   0xa   : > { %p45_p0 = scmp.ne.s32.totalorder %s940_s25, %s936_s24  ;;  %p46_p1 = scmp.eq.s32.totalorder %s1018_s28, 0 }
   0xb   : > { %p195_p2 = scmp.eq.s32.totalorder %s1018_s28, 1  ;;  %p201_p3 = scmp.eq.s32.totalorder %s632_s29, 1 }
   0xc   : > { %p1027_p4 = por %p46_p1, %p45_p0  ;;  %p633_p5 = scmp.ge.s32.totalorder %s948_s27, 1 }
   0xd   : > { %p1032_p6 = por %p201_p3, %p45_p0  ;;  %p208_p7 = scmp.lt.s32.totalorder %s948_s27, 3 }
   0xe   : > { %s1199_s1 = sld [smem:[#allocation15_spill]]  ;;  %s950_s13 = smov [#allocation5]  }
   0xf   : > { %p1040_p8 = pnand %p633_p5, %p208_p7  ;;  %s221_s14 = sshll.u32 %s950_s13, 4  ;;  %s222_s14 = int_to_ptr.vmem [resolvable:$true] %s221_s14 }
  0x10   : > { %s236_s18 = sshll.u32 %s1189_s3, 4  ;;  %s1194_s19 = smov 128   ;;  %s237_s18 = int_to_ptr.hbm [resolvable:$true] %s236_s18 }
  0x11   : > { %p686_p9 = pneg %p1040_p8  ;;  %s1195_s20 = smov 8  }
  0x12   : > { %s953_s21 = smov [#allocation7]   ;;  %s253_s9 = sshll.u32 %s1191_s5, 4  ;;  %s254_s9 = int_to_ptr.hbm [resolvable:$true] %s253_s9 }
  0x13   : > { %p1048_p10 = pnand %p686_p9, %p46_p1  ;;  %s238_s22 = sshll.u32 %s953_s21, 4  ;;  %s239_s22 = int_to_ptr.vmem [resolvable:$true] %s238_s22 }
  0x14   : > { %s219_s11 = sshll.u32 %s1199_s1, 4  ;;  %s954_s10 = smov [#allocation8]   ;;  %s220_s11 = int_to_ptr.hbm [resolvable:$true] %s219_s11 }
  0x15   : > { %689 = dma.hbm_to_vmem [thread:$0]  (!%p1048_p10), %s220_s11, 2048, %s222_s14, [#allocation6], %s1194_s19, %s1194_s19, %s1195_s20  }
  0x16   : > { %692 = dma.hbm_to_vmem [thread:$0]  (!%p1048_p10), %s237_s18, 2048, %s239_s22, [#allocation6], %s1194_s19, %s1194_s19, %s1195_s20  }
  0x17   : > { %s255_s11 = sshll.u32 %s954_s10, 4  ;;  %s1070_s13 = sadd.s32 1, %s948_s27   ;;  %s256_s11 = int_to_ptr.vmem [resolvable:$true] %s255_s11 }
  0x18   : > { %695 = dma.hbm_to_vmem [thread:$0]  (!%p1048_p10), %s254_s9, 2048, %s256_s11, [#allocation9], %s1194_s19, %s1194_s19, %s1195_s20  }
  0x19   : > { %s29_s14 = ssub.s32 %s948_s27, %s1070_s13  ;;  %s32_s16 = sadd.s32 1, %s944_s26 }
  0x1a   : > { %p30_p12 = scmp.eq.s32.totalorder %s29_s14, 0  ;;  %p39_p13 = scmp.ne.s32.totalorder %s944_s26, %s940_s25 }
  0x1b   : > { %p40_p0 = scmp.eq.s32.totalorder %s948_s27, 0  ;;  %p707_p5 = scmp.lt.s32.totalorder %s948_s27, 2 }
  0x1c   : > { %s1084_s17 = scalar_select %p30_p12, %s944_s26, %s32_s16  }
  0x1d   : > { %p1088_p3 = por %p195_p2, %p39_p13  ;;  %s272_s21 = sand.u32 1, %s944_s26  }
  0x1e   : > { %s652_s15 = sshll.u32 %s948_s27, 5  ;;  %p41_p7 = por %p40_p0, %p39_p13 }
  0x1f   : > { %s638_s22 = sshll.u32 %s272_s21, 5  ;;  %s281_s9 = scalar_lea.hbm %s1186_s0, %s652_s15 }
  0x20   : > { %s282_s10 = sshll.u32 %s281_s9, 4  ;;  %s276_s11 = scalar_lea.vmem [#allocation2], %s638_s22  ;;  %s283_s10 = int_to_ptr.hbm [resolvable:$true] %s282_s10 }
  0x21   : > { %s284_s14 = sshll.u32 %s276_s11, 4  ;;  %p1098_p9 = pnand %p707_p5, %p41_p7  ;;  %s285_s14 = int_to_ptr.vmem [resolvable:$true] %s284_s14 }
  0x22   : > { %s273_s19 = scalar_lea.sflag [#allocation3], %s272_s21  ;;  %s844_s20 = sshra.s32 %s283_s10, 4  ;;  %s845_s20 = int_to_ptr.hbm [resolvable:$true] %s844_s20 }
  0x23   : > { %s846_s1 = scalar_lea.hbm %s845_s20, 32  ;;  %p848_p10 = pneg %p1098_p9 }
  0x24   : > { %p847_p2 = scmp.ne.s32.totalorder %s845_s20, %s846_s1  ;;  %s851_s22 = scalar_lea.hbm %s1186_s0, 64 }
  0x25   : > { %p852_p0 = scmp.lt.s32.totalorder %s845_s20, %s1186_s0  ;;  %p853_p5 = scmp.lt.s32.totalorder %s851_s22, %s846_s1 }
  0x26   : > { %p849_p12 = pnand %p848_p10, %p847_p2 }
  0x27   : > { %p854_p7 = por %p853_p5, %p852_p0 }
  0x28   : > { %p850_p13 = pneg %p849_p12 }
  0x2a   : > { %p855_p11 = pnand %p854_p7, %p850_p13 }
  0x2c   : > { %858 = shalt.err (!%p855_p11)
}
  0x2d   : > { %s1204_s21 = smov 8   ;;  %s1205_s11 = smov 128  }
  0x2e   : > { %699 = dma.hbm_to_vmem [thread:$0]  (!%p1098_p9), %s283_s10, 512, %s285_s14, %s273_s19, %s1205_s11, %s1205_s11, %s1204_s21  }
  0x2f   : > { %296 = sbr.rel (%p1040_p8) target bundleno = 511 (0x1ff), region = 48  ;;  %s1118_s15 = sand.u32 (!%p1040_p8), 1, %s940_s25  }
  0x30   : > { %s642_s1 = sshll.u32 (!%p1040_p8), %s1118_s15, 5  ;;  %s299_s20 = scalar_lea.sflag (!%p1040_p8), [#allocation3], %s1118_s15 }
  0x31   : > { %s1124_s23 = scalar_lea.vmem (!%p1040_p8), [#allocation2], %s642_s1 }
  0x34   : > { %919 = dma.done.wait (%p1027_p4), %s299_s20, 512  }
  0x35   : > { %921 = vsyncadd (%p1027_p4), %s299_s20, 4294966784 }
  0x36   : > { %923 = dma.done.wait (%p46_p1), [#allocation6], 4096  }
  0x37   : > { %925 = vsyncadd (%p46_p1), [#allocation6], 4294963200 }
  0x38   : > { %927 = dma.done.wait (%p46_p1), [#allocation9], 2048  }
  0x39   : > { %929 = vsyncadd (%p46_p1), [#allocation9], 4294965248  ;;  %v370_v0 = vld [vmem:[#allocation5 + $0x78] sm:$0xff]  ;;  %v369_v1 = vld [vmem:[#allocation5 + $0x70] sm:$0xff]  ;;  %s348_s22 = scalar_lea.vmem [#allocation10], %s642_s1  ;;  %s653_s29 = sshll.u32 %s1018_s28, 5 }
  0x3a   : > { %375 = vmatpush.msra.mxu0 %v370_v0  ;;  %654 = vmatpush.msra.mxu3 %v370_v0  ;;  %v368_v2 = vld [vmem:[#allocation5 + $0x68] sm:$0xff]  ;;  %v367_v3 = vld [vmem:[#allocation5 + $0x60] sm:$0xff]  ;;  %v366_v4 = vld [vmem:[#allocation5 + $0x58] sm:$0xff]  ;;  %s526_s11 = scalar_lea.hbm %s1193_s7, %s653_s29  ;;  %s527_s20 = sshll.u32 %s348_s22, 4  ;;  %s528_s20 = int_to_ptr.vmem [resolvable:$true] %s527_s20 }
  0x3b   : > { %v365_v5 = vld [vmem:[#allocation5 + $0x50] sm:$0xff]  ;;  %v364_v6 = vld [vmem:[#allocation5 + $0x48] sm:$0xff]  ;;  %v363_v7 = vld [vmem:[#allocation5 + $0x40] sm:$0xff]  ;;  %s515_s1 = scalar_lea.sflag [#allocation4], %s1118_s15  ;;  %s894_s10 = scalar_lea.hbm %s1193_s7, 64 }
  0x3c   : > { %376 = vmatpush.msra.mxu0 %v369_v1  ;;  %655 = vmatpush.msra.mxu3 %v369_v1  ;;  %v362_v8 = vld [vmem:[#allocation5 + $0x38] sm:$0xff]  ;;  %v361_v9 = vld [vmem:[#allocation5 + $0x30] sm:$0xff]  ;;  %v360_v12 = vld [vmem:[#allocation5 + $0x28] sm:$0xff] }
  0x3d   : > { %v423_v10 = vld [vmem:[#allocation7 + $0x78] sm:$0xff]  ;;  %v422_v11 = vld [vmem:[#allocation7 + $0x70] sm:$0xff]  ;;  %v421_v13 = vld [vmem:[#allocation7 + $0x68] sm:$0xff] }
  0x3e   : > { %377 = vmatpush.msra.mxu0 %v368_v2  ;;  %656 = vmatpush.msra.mxu3 %v368_v2  ;;  %v359_v14 = vld [vmem:[#allocation5 + $0x20] sm:$0xff]  ;;  %v358_v16 = vld [vmem:[#allocation5 + $0x18] sm:$0xff]  ;;  %v357_v18 = vld [vmem:[#allocation5 + $0x10] sm:$0xff] }
  0x3f   : > { %428 = vmatpush.msra.mxu1 %v423_v10  ;;  %v420_v15 = vld [vmem:[#allocation7 + $0x60] sm:$0xff]  ;;  %v419_v17 = vld [vmem:[#allocation7 + $0x58] sm:$0xff]  ;;  %v418_v19 = vld [vmem:[#allocation7 + $0x50] sm:$0xff] }
  0x40   : > { %378 = vmatpush.msra.mxu0 %v367_v3  ;;  %657 = vmatpush.msra.mxu3 %v367_v3  ;;  %v356_v20 = vld [vmem:[#allocation5 + $0x8] sm:$0xff]  ;;  %v355_v22 = vld [vmem:[#allocation5] sm:$0xff]  ;;  %v415_v26 = vld [vmem:[#allocation7 + $0x38] sm:$0xff] }
  0x41   : > { %429 = vmatpush.msra.mxu1 %v422_v11  ;;  %v417_v21 = vld [vmem:[#allocation7 + $0x48] sm:$0xff]  ;;  %v351_v23 = vld [vmem:[%s1124_s23] sm:$0xff]  ;;  %v414_v27 = vld [vmem:[#allocation7 + $0x30] sm:$0xff] }
  0x42   : > { %379 = vmatpush.msra.mxu0 %v366_v4  ;;  %658 = vmatpush.msra.mxu3 %v366_v4  ;;  %v352_v24 = vld [vmem:[%s1124_s23 + $0x8] sm:$0xff]  ;;  %v416_v25 = vld [vmem:[#allocation7 + $0x40] sm:$0xff]  ;;  %v353_v29 = vld [vmem:[%s1124_s23 + $0x10] sm:$0xff] }
  0x43   : > { %430 = vmatpush.msra.mxu1 %v421_v13  ;;  %v413_v28 = vld [vmem:[#allocation7 + $0x28] sm:$0xff]  ;;  %v412_v30 = vld [vmem:[#allocation7 + $0x20] sm:$0xff]  ;;  %v411_v31 = vld [vmem:[#allocation7 + $0x18] sm:$0xff] }
  0x44   : > { %380 = vmatpush.msra.mxu0 %v365_v5  ;;  %659 = vmatpush.msra.mxu3 %v365_v5  ;;  %v354_v32 = vld [vmem:[%s1124_s23 + $0x18] sm:$0xff]  ;;  %v410_v33 = vld [vmem:[#allocation7 + $0x10] sm:$0xff]  ;;  %v409_v34 = vld [vmem:[#allocation7 + $0x8] sm:$0xff]  ;;  %s529_s23 = sshll.u32 %s526_s11, 4  ;;  %s530_s23 = int_to_ptr.hbm [resolvable:$true] %s529_s23 }
  0x45   : > { %431 = vmatpush.msra.mxu1 %v420_v15  ;;  %v408_v35 = vld [vmem:[#allocation7] sm:$0xff]  ;;  %v476_v37 = vld [vmem:[#allocation8 + $0x78] sm:$0xff]  ;;  %v475_v38 = vld [vmem:[#allocation8 + $0x70] sm:$0xff]  ;;  %s888_s30 = sshra.s32 %s530_s23, 4  ;;  %s889_s30 = int_to_ptr.hbm [resolvable:$true] %s888_s30 }
  0x46   : > { %381 = vmatpush.msra.mxu0 %v364_v6  ;;  %660 = vmatpush.msra.mxu3 %v364_v6  ;;  %v751_v36 = vld [vmem:[%s1188_s2] ss:$0 sm:$0xff]  ;;  %v474_v39 = vld [vmem:[#allocation8 + $0x68] sm:$0xff]  ;;  %v472_v44 = vld [vmem:[#allocation8 + $0x58] sm:$0xff]  ;;  %s890_s12 = scalar_lea.hbm %s889_s30, 32  ;;  %p895_p11 = scmp.lt.s32.totalorder %s889_s30, %s1193_s7 }
  0x47   : > { %432 = vmatpush.msra.mxu1 %v419_v17  ;;  %481 = vmatpush.msra.mxu2 %v476_v37  ;;  %v473_v42 = vld [vmem:[#allocation8 + $0x60] sm:$0xff]  ;;  %v471_v45 = vld [vmem:[#allocation8 + $0x50] sm:$0xff]  ;;  %v470_v48 = vld [vmem:[#allocation8 + $0x48] sm:$0xff]  ;;  %p891_p1 = scmp.ne.s32.totalorder %s889_s30, %s890_s12  ;;  %p896_p9 = scmp.lt.s32.totalorder %s894_s10, %s890_s12 }
  0x48   : > { %382 = vmatpush.msra.mxu0 %v363_v7  ;;  %661 = vmatpush.msra.mxu3 %v363_v7  ;;  %v469_v50 = vld [vmem:[#allocation8 + $0x40] sm:$0xff]  ;;  %v468_v51 = vld [vmem:[#allocation8 + $0x38] sm:$0xff]  ;;  %v467_v52 = vld [vmem:[#allocation8 + $0x30] sm:$0xff] }
  0x49   : > { %433 = vmatpush.msra.mxu1 %v418_v19  ;;  %482 = vmatpush.msra.mxu2 %v475_v38  ;;  %v466_v55 = vld [vmem:[#allocation8 + $0x28] sm:$0xff]  ;;  %v465_v57 = vld [vmem:[#allocation8 + $0x20] sm:$0xff]  ;;  %v464_v58 = vld [vmem:[#allocation8 + $0x18] sm:$0xff]  ;;  %p892_p4 = pnand %p891_p1, %p1088_p3  ;;  %p897_p2 = por %p896_p9, %p895_p11 }
  0x4a   : > { %383 = vmatpush.msra.mxu0 %v362_v8  ;;  %662 = vmatpush.msra.mxu3 %v362_v8  ;;  %v463_v62 = vld [vmem:[#allocation8 + $0x10] sm:$0xff]  ;;  %v462_v63 = vld [vmem:[#allocation8 + $0x8] sm:$0xff]  ;;  %v461_v0 = vld [vmem:[#allocation8] sm:$0xff] }
  0x4b   : > { %434 = vmatpush.msra.mxu1 %v417_v21  ;;  %483 = vmatpush.msra.mxu2 %v474_v39  ;;  %v752_v1 = vld [vmem:[%s1190_s4] ss:$0 sm:$0xff]  ;;  %p893_p8 = pneg %p892_p4 }
  0x4c   : > { %384 = vmatpush.msra.mxu0 %v361_v9  ;;  %663 = vmatpush.msra.mxu3 %v361_v9 }
  0x4d   : > { %435 = vmatpush.msra.mxu1 %v416_v25  ;;  %484 = vmatpush.msra.mxu2 %v473_v42  ;;  %p898_p10 = pnand %p897_p2, %p893_p8 }
  0x4e   : > { %385 = vmatpush.msra.mxu0 %v360_v12  ;;  %664 = vmatpush.msra.mxu3 %v360_v12 }
  0x4f   : > { %436 = vmatpush.msra.mxu1 %v415_v26  ;;  %485 = vmatpush.msra.mxu2 %v472_v44 }
  0x50   : > { %386 = vmatpush.msra.mxu0 %v359_v14  ;;  %665 = vmatpush.msra.mxu3 %v359_v14  ;;  %v753_v14 = vld [vmem:[%s1192_s6] ss:$0 sm:$0xff] }
  0x51   : > { %437 = vmatpush.msra.mxu1 %v414_v27  ;;  %486 = vmatpush.msra.mxu2 %v471_v45 }
  0x52   : > { %387 = vmatpush.msra.mxu0 %v358_v16  ;;  %666 = vmatpush.msra.mxu3 %v358_v16 }
  0x53   : > { %438 = vmatpush.msra.mxu1 %v413_v28  ;;  %487 = vmatpush.msra.mxu2 %v470_v48 }
  0x54   : > { %388 = vmatpush.msra.mxu0 %v357_v18  ;;  %667 = vmatpush.msra.mxu3 %v357_v18 }
  0x55   : > { %439 = vmatpush.msra.mxu1 %v412_v30  ;;  %488 = vmatpush.msra.mxu2 %v469_v50 }
  0x56   : > { %389 = vmatpush.msra.mxu0 %v356_v20  ;;  %668 = vmatpush.msra.mxu3 %v356_v20 }
  0x57   : > { %440 = vmatpush.msra.mxu1 %v411_v31  ;;  %489 = vmatpush.msra.mxu2 %v468_v51 }
  0x58   : > { %390 = vmatpush.msra.mxu0 %v355_v22  ;;  %669 = vmatpush.msra.mxu3 %v355_v22 }
  0x59   : > { %391 = vmatmul.f32.vlgmr.msra.gmra.mxu0 %v351_v23  ;;  %394 = vmatmul.f32.vlgmr.msra.gmra.mxu3 %v352_v24 }
  0x5a   : > { %441 = vmatpush.msra.mxu1 %v410_v33  ;;  %490 = vmatpush.msra.mxu2 %v467_v52 }
  0x5c   : > { %442 = vmatpush.msra.mxu1 %v409_v34  ;;  %491 = vmatpush.msra.mxu2 %v466_v55 }
  0x5e   : > { %443 = vmatpush.msra.mxu1 %v408_v35  ;;  %492 = vmatpush.msra.mxu2 %v465_v57 }
  0x60   : > { %493 = vmatpush.msra.mxu2 %v464_v58 }
  0x61   : > { %397 = vmatmul.f32.gmra.mxu3 %v353_v29 }
  0x62   : > { %494 = vmatpush.msra.mxu2 %v463_v62 }
  0x64   : > { %495 = vmatpush.msra.mxu2 %v462_v63 }
  0x66   : > { %496 = vmatpush.msra.mxu2 %v461_v0 }
  0x69   : > { %400 = vmatmul.f32.gmra.mxu3 %v354_v32 }
  0xd6   : > { %v392_v40 = vpop.f32.mrf.mxu0 }
  0xd7   : > { %v393_v41 = vadd.f32 %v751_v36, %v392_v40 }
  0xd9   : > { %v404_v43 = vmax.f32 %v393_v41, 0.0 }
  0xdb   : > { %444 = vmatmul.f32.vlgmr.msra.gmra.mxu1 %v404_v43 }
  0xdc   : > { %v395_v46 = vpop.f32.mrf.mxu3 }
  0xdd   : > { %v396_v47 = vadd.f32 %v751_v36, %v395_v46 }
  0xdf   : > { %v405_v49 = vmax.f32 %v396_v47, 0.0 }
  0xe3   : > { %447 = vmatmul.f32.gmra.mxu1 %v405_v49 }
  0xe4   : > { %v398_v53 = vpop.f32.mrf.mxu3 }
  0xe5   : > { %v399_v54 = vadd.f32 %v751_v36, %v398_v53 }
  0xe7   : > { %v406_v56 = vmax.f32 %v399_v54, 0.0 }
  0xeb   : > { %450 = vmatmul.f32.gmra.mxu1 %v406_v56 }
  0xec   : > { %v401_v59 = vpop.f32.mrf.mxu3 }
  0xed   : > { %v402_v60 = vadd.f32 %v751_v36, %v401_v59 }
  0xef   : > { %v407_v61 = vmax.f32 %v402_v60, 0.0 }
  0xf3   : > { %453 = vmatmul.f32.gmra.mxu1 %v407_v61 }
 0x158   : > { %v445_v2 = vpop.f32.mrf.mxu1 }
 0x159   : > { %v446_v3 = vadd.f32 %v752_v1, %v445_v2 }
 0x15b   : > { %v457_v4 = vmax.f32 %v446_v3, 0.0 }
 0x15d   : > { %497 = vmatmul.f32.vlgmr.msra.gmra.mxu2 %v457_v4 }
 0x160   : > { %v448_v5 = vpop.f32.mrf.mxu1 }
 0x161   : > { %v449_v6 = vadd.f32 %v752_v1, %v448_v5 }
 0x163   : > { %v458_v7 = vmax.f32 %v449_v6, 0.0 }
 0x165   : > { %500 = vmatmul.f32.gmra.mxu2 %v458_v7 }
 0x168   : > { %v451_v8 = vpop.f32.mrf.mxu1 }
 0x169   : > { %v452_v9 = vadd.f32 %v752_v1, %v451_v8 }
 0x16b   : > { %v459_v10 = vmax.f32 %v452_v9, 0.0 }
 0x16d   : > { %503 = vmatmul.f32.gmra.mxu2 %v459_v10 }
 0x170   : > { %v454_v11 = vpop.f32.mrf.mxu1 }
 0x171   : > { %v455_v12 = vadd.f32 %v752_v1, %v454_v11 }
 0x173   : > { %v460_v13 = vmax.f32 %v455_v12, 0.0 }
 0x175   : > { %506 = vmatmul.f32.gmra.mxu2 %v460_v13 }
 0x1e0   : > { %v498_v15 = vpop.f32.mrf.mxu2 }
 0x1e1   : > { %v499_v16 = vadd.f32 %v753_v14, %v498_v15 }
 0x1e3   : > { %510 = vst [vmem:[%s348_s22] sm:$0xff] %v499_v16 }
 0x1e8   : > { %v501_v17 = vpop.f32.mrf.mxu2 }
 0x1e9   : > { %v502_v18 = vadd.f32 %v753_v14, %v501_v17 }
 0x1eb   : > { %511 = vst [vmem:[%s348_s22 + $0x8] sm:$0xff] %v502_v18 }
 0x1f0   : > { %v504_v19 = vpop.f32.mrf.mxu2 }
 0x1f1   : > { %v505_v20 = vadd.f32 %v753_v14, %v504_v19 }
 0x1f3   : > { %512 = vst [vmem:[%s348_s22 + $0x10] sm:$0xff] %v505_v20 }
 0x1f8   : > { %v507_v21 = vpop.f32.mrf.mxu2 }
 0x1f9   : > { %v508_v22 = vadd.f32 %v753_v14, %v507_v21 }
 0x1fb   : > { %513 = vst [vmem:[%s348_s22 + $0x18] sm:$0xff] %v508_v22 }
 0x1fc   : > { %901 = shalt.err (!%p898_p10)
}
 0x1fd   : > { %s955_s15 = smov 128   ;;  %s956_s22 = smov 8  }
 0x1fe   : > { %684 = dma.vmem_to_hbm [thread:$0]  (%p1088_p3), %s528_s20, 512, %s530_s23, %s515_s1, %s955_s15, %s955_s15, %s956_s22  }
 0x1ff PF: > { %s544_s29 = sand.u32 1, %s936_s24   ;;  %p1206_p12 = scmp.ge.s32.totalorder %s948_s27, 2 }
 0x200   : > { %s545_s9 = scalar_lea.sflag [#allocation4], %s544_s29 }
 0x201   : > { %p701_p13 = pnand %p1206_p12, %p1032_p6 }
 0x203   : > { %p702_p0 = pneg %p701_p13 }
 0x205   : > { %931 = dma.done.wait (%p702_p0), %s545_s9, 512  }
 0x206   : > { %933 = vsyncadd (%p702_p0), %s545_s9, 4294966784  ;;  %p22_p5 = scmp.ge.s32.totalorder %s1070_s13, 4   ;;  %s1207_s24 = smov %s940_s25 }
 0x207   : > { %s1208_s25 = smov %s944_s26  ;;  %s1209_s26 = smov %s1084_s17 }
 0x208   : > { %s1210_s27 = smov %s1070_s13  ;;  %24 = sbr.rel (!%p22_p5) target bundleno = 9 (0x9), region = 105 }
 0x20d   :  { %551 = vsyncpa [#allocation3], 1 }
 0x20e   :  { %553 = vsyncpa [#allocation3 + $0x1], 1 }
 0x20f   :  { %554 = vsyncpa [#allocation6], 1 }
 0x210   :  { %555 = vsyncpa [#allocation9], 1 }
 0x211   :  { %556 = vsyncpa [#allocation4], 1 }
 0x212   :  { %558 = vsyncpa [#allocation4 + $0x1], 1 }

</bundles_post_ra>
